<compile_context>
chip_gen: v7x
topology: tpu7x:2x2x1
jax: 0.10.0
libtpu: 0.0.40
codegen_flags: <defaults>
</compile_context>

<pallas_src>
import functools

import jax
import jax.numpy as jnp
from jax.experimental import pallas as pl
from jax.experimental.pallas import tpu as pltpu

EPS = 1e-5
NEG_SLOPE = 0.01                      # F.leaky_relu default
REL_ORDER = ("n", "poi", "s", "d")    # lane-packing order == module output order


# ------------------------------- Pallas kernel ------------------------------ #

def _fused_relation_gcn_kernel(a_ref, feat_ref, r0_ref,
                               w_ref, b_ref, gamma_ref, beta_ref,
                               rel_w_ref, rel_b_ref,
                               emb_ref, r_ref, ebd_ref):
    """One grid step == one GCN layer, all 4 relations lane-packed.

    a_ref    : (N, 4N)  bf16  horizontally concatenated A_hat's (REL_ORDER)
    feat_ref : (N, 4E)  f32   features tiled 4x along lanes (used at layer 0)
    r0_ref   : (1, 4E)  f32   lane-packed initial relation embeddings
    w_ref    : (4E, 4E) bf16  kron(I4, W_layer)         (GraphConv weight)
    b_ref    : (1, 4E)  f32   lane-tiled GraphConv bias
    gamma_ref/beta_ref : (1, 4E) f32 lane-tiled BN params (padded for last layer)
    rel_w_ref: (4E, 4E) bf16  kron(I4, rel_W_layer)     (relation Linear)
    rel_b_ref: (1, 4E)  f32   lane-tiled relation Linear bias
    emb_ref  : (N, 4E)  f32   output / cross-layer carry (constant block index)
    r_ref    : (8, 4E)  f32   output / cross-layer carry (rows replicated)
    ebd_ref  : (4N, 4E) bf16  scratch: block-diagonal feature operand
    """
    layer = pl.program_id(0)
    n_layers = pl.num_programs(0)
    N = a_ref.shape[0]
    E4 = feat_ref.shape[1]
    E = E4 // 4

    @pl.when(layer == 0)
    def _init():
        emb_ref[...] = feat_ref[...]
        r_ref[...] = jnp.broadcast_to(r0_ref[...], r_ref.shape)
        ebd_ref[...] = jnp.zeros_like(ebd_ref)   # off-diag blocks stay 0 forever

    # h_k = emb_k * r_k — lane-dense broadcast multiply (relations occupy
    # disjoint lane blocks), matching gcns[l](g_k, emb_k * r_k) op order.
    h = (emb_ref[...] * r_ref[0:1, :]).astype(jnp.bfloat16)        # (N, 4E)

    # Write ONLY the 4 diagonal (N, E) blocks of the block-diagonal operand.
    for k in range(4):
        ebd_ref[k * N:(k + 1) * N, k * E:(k + 1) * E] = h[:, k * E:(k + 1) * E]

    # One fused MXU matmul computes all 4 per-relation aggregations:
    #   (N, 4N) @ (4N, 4E) -> (N, 4E),  K = 4N matches the 256-wide MXU on
    #   v6e/v7x (two 128-wide passes on v5e).
    agg = jnp.dot(a_ref[...], ebd_ref[...], preferred_element_type=jnp.float32)
    # Shared GraphConv weight applied per relation via block-diagonal W.
    y = jnp.dot(agg.astype(jnp.bfloat16), w_ref[...],
                preferred_element_type=jnp.float32) + b_ref[...]   # (N, 4E) f32

    @pl.when(layer < n_layers - 1)
    def _hidden_layer():
        # BatchNorm1d (biased batch stats over nodes); per-column stats are
        # automatically per-relation since relations live in disjoint lanes.
        mean = jnp.mean(y, axis=0, keepdims=True)                  # (1, 4E)
        yc = y - mean
        var = jnp.mean(yc * yc, axis=0, keepdims=True)
        scale = gamma_ref[...] * jax.lax.rsqrt(var + EPS)          # fused scale
        yhat = yc * scale + beta_ref[...]
        act = jnp.where(yhat >= 0, yhat, NEG_SLOPE * yhat)         # leaky_relu
        emb_ref[...] = emb_ref[...] + act                          # residual
        # TODO(synk): F.dropout skipped (inference path).

    @pl.when(layer == n_layers - 1)
    def _final_layer():
        emb_ref[...] = y       # final GCN layer: no BN / activation / residual

    # Relation transformation (shared Linear), applied every layer AFTER the
    # GraphConv of that layer (matches torch statement order).
    r_ref[...] = (jnp.dot(r_ref[...].astype(jnp.bfloat16), rel_w_ref[...],
                          preferred_element_type=jnp.float32) + rel_b_ref[...])


# ----------------------------- parameter packing ---------------------------- #

def pack_params(params, embedding_size):
    """Stack per-layer params and expand to the lane-packed 4-relation form.

    Done ONCE outside jit so the kron / tile expansions are not re-emitted as
    per-call XLA ops on every forward.
    """
    E = embedding_size
    n_layers = len(params["gcn_w"])
    assert n_layers >= 2, "gcn_layers must be >= 2"
    eye4 = jnp.eye(4, dtype=jnp.float32)

    def block_diag(w):                       # (E,E) -> (4E,4E) = kron(I4, W)
        return jnp.kron(eye4, w.astype(jnp.float32))

    def lane_tile(v):                        # (1,E)/(E,) -> (1,4E)
        return jnp.tile(jnp.reshape(v.astype(jnp.float32), (1, E)), (1, 4))

    w_bd = jnp.stack([block_diag(w) for w in params["gcn_w"]]).astype(jnp.bfloat16)
    b_pk = jnp.stack([lane_tile(b) for b in params["gcn_b"]])
    rel_w_bd = jnp.stack([block_diag(w) for w in params["rel_w"]]).astype(jnp.bfloat16)
    rel_b_pk = jnp.stack([lane_tile(b) for b in params["rel_b"]])
    # Pad BN params to n_layers entries so the layer-grid BlockSpec never
    # indexes out of range (the last entry is fetched but unused).
    gammas = list(params["bn_gamma"]) + [jnp.ones((1, E), jnp.float32)]
    betas = list(params["bn_beta"]) + [jnp.zeros((1, E), jnp.float32)]
    gamma_pk = jnp.stack([lane_tile(g) for g in gammas])
    beta_pk = jnp.stack([lane_tile(b) for b in betas])
    return {"w": w_bd, "b": b_pk, "gamma": gamma_pk, "beta": beta_pk,
            "rel_w": rel_w_bd, "rel_b": rel_b_pk}


# ----------------------------- pallas_call glue ----------------------------- #

def relation_gcn_forward(features, rel_emb, a_hats, packed, is_training=False):
    """Mirrors RelationGCN.forward (dropout omitted; BN uses batch stats).

    features : (N, E)
    rel_emb  : tuple (poi_r, s_r, d_r, n_r), each (1, E)
    a_hats   : tuple (poi_A, s_A, d_A, n_A), each (N, N) normalized adjacency
    packed   : output of pack_params()
    """
    del is_training  # TODO(synk): dropout not implemented (inference path)
    poi_r, s_r, d_r, n_r = rel_emb
    poi_A, s_A, d_A, n_A = a_hats
    N, E = features.shape
    E4 = 4 * E
    n_layers = packed["w"].shape[0]

    rel = {"n": n_r, "poi": poi_r, "s": s_r, "d": d_r}
    adj = {"n": n_A, "poi": poi_A, "s": s_A, "d": d_A}

    # Lane/row packing (order REL_ORDER = n, poi, s, d).
    a_cat = jnp.concatenate([adj[k].astype(jnp.float32) for k in REL_ORDER],
                            axis=1).astype(jnp.bfloat16)                  # (N, 4N)
    feat_pk = jnp.tile(features.astype(jnp.float32), (1, 4))              # (N, 4E)
    r0 = jnp.concatenate([jnp.reshape(rel[k].astype(jnp.float32), (1, E))
                          for k in REL_ORDER], axis=1)                    # (1, 4E)

    same2 = lambda l: (0, 0)
    per_layer = lambda l: (l, 0, 0)

    grid_spec = pltpu.PrefetchScalarGridSpec(
        num_scalar_prefetch=0,
        grid=(n_layers,),
        in_specs=[
            pl.BlockSpec((N, 4 * N), same2),          # a_cat   (bf16)
            pl.BlockSpec((N, E4), same2),             # feat    (f32)
            pl.BlockSpec((1, E4), same2),             # r0      (f32)
            pl.BlockSpec((None, E4, E4), per_layer),  # kron(I4, W_l)     bf16
            pl.BlockSpec((None, 1, E4), per_layer),   # GraphConv bias    f32
            pl.BlockSpec((None, 1, E4), per_layer),   # BN gamma          f32
            pl.BlockSpec((None, 1, E4), per_layer),   # BN beta           f32
            pl.BlockSpec((None, E4, E4), per_layer),  # kron(I4, rel_W_l) bf16
            pl.BlockSpec((None, 1, E4), per_layer),   # rel Linear bias   f32
        ],
        out_specs=(
            pl.BlockSpec((N, E4), same2),             # emb carry / output
            pl.BlockSpec((8, E4), same2),             # r   carry / output
        ),
        scratch_shapes=[pltpu.VMEM((4 * N, E4), jnp.bfloat16)],
    )

    emb_out, r_out = pl.pallas_call(
        _fused_relation_gcn_kernel,
        out_shape=(jax.ShapeDtypeStruct((N, E4), jnp.float32),
                   jax.ShapeDtypeStruct((8, E4), jnp.float32)),
        grid_spec=grid_spec,
        compiler_params=pltpu.CompilerParams(
            dimension_semantics=("arbitrary",)),
    )(a_cat, feat_pk, r0,
      packed["w"], packed["b"], packed["gamma"], packed["beta"],
      packed["rel_w"], packed["rel_b"])

    embs = {k: emb_out[:, i * E:(i + 1) * E] for i, k in enumerate(REL_ORDER)}
    rrow = r_out[0]
    routs = {k: rrow[i * E:(i + 1) * E] for i, k in enumerate(REL_ORDER)}
    return (embs["n"], embs["poi"], embs["s"], embs["d"],
            routs["n"], routs["poi"], routs["s"], routs["d"])


# --------------------------- pure-JAX reference ----------------------------- #

def relation_gcn_reference(features, rel_emb, a_hats, params):
    poi_r, s_r, d_r, n_r = rel_emb
    poi_A, s_A, d_A, n_A = a_hats
    embs = {k: features for k in REL_ORDER}
    rs = {"n": n_r, "poi": poi_r, "s": s_r, "d": d_r}
    As = {"n": n_A, "poi": poi_A, "s": s_A, "d": d_A}
    n_layers = len(params["gcn_w"])

    def gconv(A, x, W, b):
        return A @ x @ W + b

    for i in range(n_layers - 1):
        for k in REL_ORDER:
            y = gconv(As[k], embs[k] * rs[k], params["gcn_w"][i], params["gcn_b"][i])
            mean = jnp.mean(y, axis=0, keepdims=True)
            var = jnp.mean(jnp.square(y - mean), axis=0, keepdims=True)
            yhat = params["bn_gamma"][i] * ((y - mean) * jax.lax.rsqrt(var + EPS)) \
                   + params["bn_beta"][i]
            embs[k] = embs[k] + jnp.where(yhat >= 0, yhat, NEG_SLOPE * yhat)
            rs[k] = rs[k] @ params["rel_w"][i] + params["rel_b"][i]
    for k in REL_ORDER:
        embs[k] = gconv(As[k], embs[k] * rs[k], params["gcn_w"][-1], params["gcn_b"][-1])
        rs[k] = rs[k] @ params["rel_w"][-1] + params["rel_b"][-1]
    return (embs["n"], embs["poi"], embs["s"], embs["d"],
            rs["n"][0], rs["poi"][0], rs["s"][0], rs["d"][0])


# ------------------------------ parameter init ------------------------------ #

def init_params(key, embedding_size, gcn_layers):
    params = {"gcn_w": [], "gcn_b": [], "bn_gamma": [], "bn_beta": [],
              "rel_w": [], "rel_b": []}
    for _ in range(gcn_layers):
        key, k1, k2, k3 = jax.random.split(key, 4)
        # GraphConv weight (in_feats, out_feats), bias (out_feats,) (init 0)
        params["gcn_w"].append(
            jax.random.normal(k1, (embedding_size, embedding_size), jnp.float32) * 0.1)
        params["gcn_b"].append(jnp.zeros((1, embedding_size), jnp.float32))
        # nn.Linear weight stored pre-transposed as (in, out); bias (out,)
        params["rel_w"].append(
            jax.random.normal(k2, (embedding_size, embedding_size), jnp.float32) * 0.1)
        params["rel_b"].append(
            jax.random.normal(k3, (1, embedding_size), jnp.float32) * 0.1)
    for _ in range(gcn_layers - 1):
        params["bn_gamma"].append(jnp.ones((1, embedding_size), jnp.float32))
        params["bn_beta"].append(jnp.zeros((1, embedding_size), jnp.float32))
    return params


def make_normalized_adjacency(key, n_nodes):
    a = (jax.random.uniform(key, (n_nodes, n_nodes)) < 0.1).astype(jnp.float32)
    a = jnp.maximum(a, a.T)
    a = jnp.maximum(a, jnp.eye(n_nodes, dtype=jnp.float32))  # avoid zero degree
    deg = jnp.sum(a, axis=1)
    d_inv_sqrt = 1.0 / jnp.sqrt(deg)
    return a * d_inv_sqrt[:, None] * d_inv_sqrt[None, :]


# ----------------------------------- main ----------------------------------- #

if __name__ == "__main__":
    N = 64            # number of nodes / regions
    E = 32            # embedding_size  (4 relations -> 128 lanes, lane-dense)
    GCN_LAYERS = 3    # gcn_layers

    key = jax.random.PRNGKey(0)
    key, kf, kp, kr = jax.random.split(key, 4)

    features = jax.random.normal(kf, (N, E), jnp.float32)

    rkeys = jax.random.split(kr, 4)
    rel_emb = tuple(jax.random.normal(k, (1, E), jnp.float32) for k in rkeys)  # poi, s, d, n

    akeys = jax.random.split(kp, 4)
    a_hats = tuple(make_normalized_adjacency(k, N) for k in akeys)             # poi, s, d, n

    params = init_params(key, E, GCN_LAYERS)
    packed = pack_params(params, E)   # static packing done once, outside jit

    fwd = jax.jit(functools.partial(relation_gcn_forward, packed=packed,
                                    is_training=False))
    outs = jax.block_until_ready(fwd(features, rel_emb, a_hats))

    # shape / finiteness sanity
    assert all(o.shape == (N, E) for o in outs[:4])
    assert all(o.shape == (E,) for o in outs[4:])
    assert all(bool(jnp.all(jnp.isfinite(o))) for o in outs)

    # numerical check against the pure-JAX f32 reference (tolerance covers the
    # bf16 MXU operands; packing/semantics bugs would produce O(1) errors)
    ref_outs = relation_gcn_reference(features, rel_emb, a_hats, params)
    for o, ref in zip(outs, ref_outs):
        assert bool(jnp.allclose(o, ref, rtol=5e-2, atol=5e-2)), \
            f"max abs diff {float(jnp.max(jnp.abs(o - ref)))}"

    print("KERNEL_OK")
</pallas_src>

<mosaic_0001>
module attributes {stable_mosaic.version = 11 : i64} {
  func.func @_fused_relation_gcn_kernel(%arg0: i32, %arg1: memref<64x256xbf16, #tpu.memory_space<vmem>>, %arg2: memref<64x128xf32, #tpu.memory_space<vmem>>, %arg3: memref<1x128xf32, #tpu.memory_space<vmem>>, %arg4: memref<1x128x128xbf16, #tpu.memory_space<vmem>>, %arg5: memref<1x1x128xf32, #tpu.memory_space<vmem>>, %arg6: memref<1x1x128xf32, #tpu.memory_space<vmem>>, %arg7: memref<1x1x128xf32, #tpu.memory_space<vmem>>, %arg8: memref<1x128x128xbf16, #tpu.memory_space<vmem>>, %arg9: memref<1x1x128xf32, #tpu.memory_space<vmem>>, %arg10: memref<64x128xf32, #tpu.memory_space<vmem>>, %arg11: memref<8x128xf32, #tpu.memory_space<vmem>>, %arg12: memref<256x128xbf16, #tpu.memory_space<vmem>>) attributes {dimension_semantics = [#tpu.dimension_semantics<arbitrary>], iteration_bounds = array<i64: 3>, scalar_prefetch = 0 : i64, scratch_operands = 1 : i64, tpu.core_type = #tpu.core_type<tc>, window_params = [{pipeline_mode = #tpu.pipeline_mode<synchronous>, transform_indices = @transform_0, window_bounds = array<i64: 64, 256>}, {pipeline_mode = #tpu.pipeline_mode<synchronous>, transform_indices = @transform_1, window_bounds = array<i64: 64, 128>}, {pipeline_mode = #tpu.pipeline_mode<synchronous>, transform_indices = @transform_2, window_bounds = array<i64: 1, 128>}, {transform_indices = @transform_3, window_bounds = array<i64: 1, 128, 128>}, {transform_indices = @transform_4, window_bounds = array<i64: 1, 1, 128>}, {transform_indices = @transform_5, window_bounds = array<i64: 1, 1, 128>}, {transform_indices = @transform_6, window_bounds = array<i64: 1, 1, 128>}, {transform_indices = @transform_7, window_bounds = array<i64: 1, 128, 128>}, {transform_indices = @transform_8, window_bounds = array<i64: 1, 1, 128>}, {pipeline_mode = #tpu.pipeline_mode<synchronous>, transform_indices = @transform_9, window_bounds = array<i64: 64, 128>}, {pipeline_mode = #tpu.pipeline_mode<synchronous>, transform_indices = @transform_10, window_bounds = array<i64: 8, 128>}]} {
    %c0_i32 = arith.constant 0 : i32
    %0 = arith.cmpi eq, %arg0, %c0_i32 : i32
    %1 = arith.extui %0 : i1 to i32
    %c0_i32_0 = arith.constant 0 : i32
    %2 = arith.cmpi ne, %1, %c0_i32_0 : i32
    scf.if %2 {
      %c0_32 = arith.constant 0 : index
      %c0_33 = arith.constant 0 : index
      %43 = vector.load %arg2[%c0_32, %c0_33] : memref<64x128xf32, #tpu.memory_space<vmem>>, vector<64x128xf32>
      %c0_34 = arith.constant 0 : index
      %c0_35 = arith.constant 0 : index
      %44 = vector.load %arg10[%c0_34, %c0_35] : memref<64x128xf32, #tpu.memory_space<vmem>>, vector<64x128xf32>
      tpu.vector_store %arg10[%c0_34, %c0_35], %43 {strides = array<i32>} : memref<64x128xf32, #tpu.memory_space<vmem>>, vector<64x128xf32>,
      %c0_36 = arith.constant 0 : index
      %c0_37 = arith.constant 0 : index
      %45 = vector.load %arg3[%c0_36, %c0_37] : memref<1x128xf32, #tpu.memory_space<vmem>>, vector<1x128xf32>
      %46 = vector.shape_cast %45 : vector<1x128xf32> to vector<1x128xf32>
      %47 = vector.broadcast %46 : vector<1x128xf32> to vector<8x128xf32>
      %c0_38 = arith.constant 0 : index
      %c0_39 = arith.constant 0 : index
      %48 = vector.load %arg11[%c0_38, %c0_39] : memref<8x128xf32, #tpu.memory_space<vmem>>, vector<8x128xf32>
      tpu.vector_store %arg11[%c0_38, %c0_39], %47 {strides = array<i32>} : memref<8x128xf32, #tpu.memory_space<vmem>>, vector<8x128xf32>,
      %cst_40 = arith.constant 0.000000e+00 : bf16
      %49 = vector.broadcast %cst_40 : bf16 to vector<256x128xbf16>
      %c0_41 = arith.constant 0 : index
      %c0_42 = arith.constant 0 : index
      %50 = vector.load %arg12[%c0_41, %c0_42] : memref<256x128xbf16, #tpu.memory_space<vmem>>, vector<256x128xbf16>
      tpu.vector_store %arg12[%c0_41, %c0_42], %49 {strides = array<i32>} : memref<256x128xbf16, #tpu.memory_space<vmem>>, vector<256x128xbf16>,
    } else {
    }
    %c0 = arith.constant 0 : index
    %c0_1 = arith.constant 0 : index
    %3 = vector.load %arg10[%c0, %c0_1] : memref<64x128xf32, #tpu.memory_space<vmem>>, vector<64x128xf32>
    %c0_2 = arith.constant 0 : index
    %c0_3 = arith.constant 0 : index
    %4 = vector.load %arg11[%c0_2, %c0_3] : memref<8x128xf32, #tpu.memory_space<vmem>>, vector<1x128xf32>
    %5 = vector.broadcast %4 : vector<1x128xf32> to vector<64x128xf32>
    %6 = arith.mulf %3, %5 : vector<64x128xf32>
    %7 = arith.truncf %6 : vector<64x128xf32> to vector<64x128xbf16>
    %8 = vector.extract_strided_slice %7 {offsets = [0, 0], sizes = [64, 32], strides = [1, 1]} : vector<64x128xbf16> to vector<64x32xbf16>
    %c0_4 = arith.constant 0 : index
    %c0_5 = arith.constant 0 : index
    %9 = vector.load %arg12[%c0_4, %c0_5] : memref<256x128xbf16, #tpu.memory_space<vmem>>, vector<64x32xbf16>
    tpu.vector_store %arg12[%c0_4, %c0_5], %8 {strides = array<i32>} : memref<256x128xbf16, #tpu.memory_space<vmem>>, vector<64x32xbf16>,
    %10 = vector.extract_strided_slice %7 {offsets = [0, 32], sizes = [64, 32], strides = [1, 1]} : vector<64x128xbf16> to vector<64x32xbf16>
    %c64 = arith.constant 64 : index
    %c32 = arith.constant 32 : index
    %11 = vector.load %arg12[%c64, %c32] : memref<256x128xbf16, #tpu.memory_space<vmem>>, vector<64x32xbf16>
    tpu.vector_store %arg12[%c64, %c32], %10 {strides = array<i32>} : memref<256x128xbf16, #tpu.memory_space<vmem>>, vector<64x32xbf16>,
    %12 = vector.extract_strided_slice %7 {offsets = [0, 64], sizes = [64, 32], strides = [1, 1]} : vector<64x128xbf16> to vector<64x32xbf16>
    %c128 = arith.constant 128 : index
    %c64_6 = arith.constant 64 : index
    %13 = vector.load %arg12[%c128, %c64_6] : memref<256x128xbf16, #tpu.memory_space<vmem>>, vector<64x32xbf16>
    tpu.vector_store %arg12[%c128, %c64_6], %12 {strides = array<i32>} : memref<256x128xbf16, #tpu.memory_space<vmem>>, vector<64x32xbf16>,
    %14 = vector.extract_strided_slice %7 {offsets = [0, 96], sizes = [64, 32], strides = [1, 1]} : vector<64x128xbf16> to vector<64x32xbf16>
    %c192 = arith.constant 192 : index
    %c96 = arith.constant 96 : index
    %15 = vector.load %arg12[%c192, %c96] : memref<256x128xbf16, #tpu.memory_space<vmem>>, vector<64x32xbf16>
    tpu.vector_store %arg12[%c192, %c96], %14 {strides = array<i32>} : memref<256x128xbf16, #tpu.memory_space<vmem>>, vector<64x32xbf16>,
    %c0_7 = arith.constant 0 : index
    %c0_8 = arith.constant 0 : index
    %16 = vector.load %arg1[%c0_7, %c0_8] : memref<64x256xbf16, #tpu.memory_space<vmem>>, vector<64x256xbf16>
    %c0_9 = arith.constant 0 : index
    %c0_10 = arith.constant 0 : index
    %17 = vector.load %arg12[%c0_9, %c0_10] : memref<256x128xbf16, #tpu.memory_space<vmem>>, vector<256x128xbf16>
    %cst = arith.constant dense<0.000000e+00> : vector<64x128xf32>
    %18 = tpu.matmul %16, %17, %cst {dimension_numbers = #tpu.dot_dimension_numbers<[1], [0], [0], [1], [0, 0, 1, 1], [], []>} : vector<64x256xbf16>, vector<256x128xbf16>, vector<64x128xf32> -> vector<64x128xf32>
    %19 = arith.truncf %18 : vector<64x128xf32> to vector<64x128xbf16>
    %c0_11 = arith.constant 0 : index
    %c0_12 = arith.constant 0 : index
    %c0_13 = arith.constant 0 : index
    %20 = vector.load %arg4[%c0_11, %c0_12, %c0_13] : memref<1x128x128xbf16, #tpu.memory_space<vmem>>, vector<1x128x128xbf16>
    %21 = vector.shape_cast %20 : vector<1x128x128xbf16> to vector<128x128xbf16>
    %cst_14 = arith.constant dense<0.000000e+00> : vector<64x128xf32>
    %22 = tpu.matmul %19, %21, %cst_14 {dimension_numbers = #tpu.dot_dimension_numbers<[1], [0], [0], [1], [0, 0, 1, 1], [], []>} : vector<64x128xbf16>, vector<128x128xbf16>, vector<64x128xf32> -> vector<64x128xf32>
    %c0_15 = arith.constant 0 : index
    %c0_16 = arith.constant 0 : index
    %c0_17 = arith.constant 0 : index
    %23 = vector.load %arg5[%c0_15, %c0_16, %c0_17] : memref<1x1x128xf32, #tpu.memory_space<vmem>>, vector<1x1x128xf32>
    %24 = vector.shape_cast %23 : vector<1x1x128xf32> to vector<1x128xf32>
    %25 = vector.broadcast %24 : vector<1x128xf32> to vector<64x128xf32>
    %26 = arith.addf %22, %25 : vector<64x128xf32>
    %c2_i32 = arith.constant 2 : i32
    %27 = arith.cmpi slt, %arg0, %c2_i32 : i32
    %28 = arith.extui %27 : i1 to i32
    %c0_i32_18 = arith.constant 0 : i32
    %29 = arith.cmpi ne, %28, %c0_i32_18 : i32
    scf.if %29 {
      %cst_32 = arith.constant dense<0.000000e+00> : vector<128xf32>
      %43 = vector.multi_reduction <add>, %26, %cst_32 [0] : vector<64x128xf32> to vector<128xf32>
      %44 = vector.shape_cast %43 : vector<128xf32> to vector<1x128xf32>
      %cst_33 = arith.constant 6.400000e+01 : f32
      %45 = vector.broadcast %cst_33 : f32 to vector<1x128xf32>
      %46 = arith.divf %44, %45 : vector<1x128xf32>
      %47 = vector.broadcast %46 : vector<1x128xf32> to vector<64x128xf32>
      %48 = arith.subf %26, %47 : vector<64x128xf32>
      %49 = arith.mulf %48, %48 : vector<64x128xf32>
      %cst_34 = arith.constant dense<0.000000e+00> : vector<128xf32>
      %50 = vector.multi_reduction <add>, %49, %cst_34 [0] : vector<64x128xf32> to vector<128xf32>
      %51 = vector.shape_cast %50 : vector<128xf32> to vector<1x128xf32>
      %cst_35 = arith.constant 6.400000e+01 : f32
      %52 = vector.broadcast %cst_35 : f32 to vector<1x128xf32>
      %53 = arith.divf %51, %52 : vector<1x128xf32>
      %c0_36 = arith.constant 0 : index
      %c0_37 = arith.constant 0 : index
      %c0_38 = arith.constant 0 : index
      %54 = vector.load %arg6[%c0_36, %c0_37, %c0_38] : memref<1x1x128xf32, #tpu.memory_space<vmem>>, vector<1x1x128xf32>
      %55 = vector.shape_cast %54 : vector<1x1x128xf32> to vector<1x128xf32>
      %cst_39 = arith.constant 9.99999974E-6 : f32
      %56 = vector.broadcast %cst_39 : f32 to vector<1x128xf32>
      %57 = arith.addf %53, %56 : vector<1x128xf32>
      %58 = math.rsqrt %57 : vector<1x128xf32>
      %59 = arith.mulf %55, %58 : vector<1x128xf32>
      %60 = vector.broadcast %59 : vector<1x128xf32> to vector<64x128xf32>
      %61 = arith.mulf %48, %60 : vector<64x128xf32>
      %c0_40 = arith.constant 0 : index
      %c0_41 = arith.constant 0 : index
      %c0_42 = arith.constant 0 : index
      %62 = vector.load %arg7[%c0_40, %c0_41, %c0_42] : memref<1x1x128xf32, #tpu.memory_space<vmem>>, vector<1x1x128xf32>
      %63 = vector.shape_cast %62 : vector<1x1x128xf32> to vector<1x128xf32>
      %64 = vector.broadcast %63 : vector<1x128xf32> to vector<64x128xf32>
      %65 = arith.addf %61, %64 : vector<64x128xf32>
      %cst_43 = arith.constant 0.000000e+00 : f32
      %66 = vector.broadcast %cst_43 : f32 to vector<64x128xf32>
      %67 = arith.cmpf oge, %65, %66 : vector<64x128xf32>
      %cst_44 = arith.constant 0.00999999977 : f32
      %68 = vector.broadcast %cst_44 : f32 to vector<64x128xf32>
      %69 = arith.mulf %68, %65 : vector<64x128xf32>
      %70 = arith.select %67, %65, %69 : vector<64x128xi1>, vector<64x128xf32>
      %c0_45 = arith.constant 0 : index
      %c0_46 = arith.constant 0 : index
      %71 = vector.load %arg10[%c0_45, %c0_46] : memref<64x128xf32, #tpu.memory_space<vmem>>, vector<64x128xf32>
      %72 = arith.addf %71, %70 : vector<64x128xf32>
      %c0_47 = arith.constant 0 : index
      %c0_48 = arith.constant 0 : index
      %73 = vector.load %arg10[%c0_47, %c0_48] : memref<64x128xf32, #tpu.memory_space<vmem>>, vector<64x128xf32>
      tpu.vector_store %arg10[%c0_47, %c0_48], %72 {strides = array<i32>} : memref<64x128xf32, #tpu.memory_space<vmem>>, vector<64x128xf32>,
    } else {
    }
    %c2_i32_19 = arith.constant 2 : i32
    %30 = arith.cmpi eq, %arg0, %c2_i32_19 : i32
    %31 = arith.extui %30 : i1 to i32
    %c0_i32_20 = arith.constant 0 : i32
    %32 = arith.cmpi ne, %31, %c0_i32_20 : i32
    scf.if %32 {
      %c0_32 = arith.constant 0 : index
      %c0_33 = arith.constant 0 : index
      %43 = vector.load %arg10[%c0_32, %c0_33] : memref<64x128xf32, #tpu.memory_space<vmem>>, vector<64x128xf32>
      tpu.vector_store %arg10[%c0_32, %c0_33], %26 {strides = array<i32>} : memref<64x128xf32, #tpu.memory_space<vmem>>, vector<64x128xf32>,
    } else {
    }
    %c0_21 = arith.constant 0 : index
    %c0_22 = arith.constant 0 : index
    %33 = vector.load %arg11[%c0_21, %c0_22] : memref<8x128xf32, #tpu.memory_space<vmem>>, vector<8x128xf32>
    %34 = arith.truncf %33 : vector<8x128xf32> to vector<8x128xbf16>
    %c0_23 = arith.constant 0 : index
    %c0_24 = arith.constant 0 : index
    %c0_25 = arith.constant 0 : index
    %35 = vector.load %arg8[%c0_23, %c0_24, %c0_25] : memref<1x128x128xbf16, #tpu.memory_space<vmem>>, vector<1x128x128xbf16>
    %36 = vector.shape_cast %35 : vector<1x128x128xbf16> to vector<128x128xbf16>
    %cst_26 = arith.constant dense<0.000000e+00> : vector<8x128xf32>
    %37 = tpu.matmul %34, %36, %cst_26 {dimension_numbers = #tpu.dot_dimension_numbers<[1], [0], [0], [1], [0, 0, 1, 1], [], []>} : vector<8x128xbf16>, vector<128x128xbf16>, vector<8x128xf32> -> vector<8x128xf32>
    %c0_27 = arith.constant 0 : index
    %c0_28 = arith.constant 0 : index
    %c0_29 = arith.constant 0 : index
    %38 = vector.load %arg9[%c0_27, %c0_28, %c0_29] : memref<1x1x128xf32, #tpu.memory_space<vmem>>, vector<1x1x128xf32>
    %39 = vector.shape_cast %38 : vector<1x1x128xf32> to vector<1x128xf32>
    %40 = vector.broadcast %39 : vector<1x128xf32> to vector<8x128xf32>
    %41 = arith.addf %37, %40 : vector<8x128xf32>
    %c0_30 = arith.constant 0 : index
    %c0_31 = arith.constant 0 : index
    %42 = vector.load %arg11[%c0_30, %c0_31] : memref<8x128xf32, #tpu.memory_space<vmem>>, vector<8x128xf32>
    tpu.vector_store %arg11[%c0_30, %c0_31], %41 {strides = array<i32>} : memref<8x128xf32, #tpu.memory_space<vmem>>, vector<8x128xf32>,
    return
  }
  func.func @transform_0(%arg0: i32) -> (i32, i32) {
    %c0_i32 = arith.constant 0 : i32
    %c0_i32_0 = arith.constant 0 : i32
    %c0_i32_1 = arith.constant 0 : i32
    return %c0_i32, %c0_i32_0 : i32, i32
  }
  func.func @transform_1(%arg0: i32) -> (i32, i32) {
    %c0_i32 = arith.constant 0 : i32
    %c0_i32_0 = arith.constant 0 : i32
    %c0_i32_1 = arith.constant 0 : i32
    return %c0_i32, %c0_i32_0 : i32, i32
  }
  func.func @transform_2(%arg0: i32) -> (i32, i32) {
    %c0_i32 = arith.constant 0 : i32
    %c0_i32_0 = arith.constant 0 : i32
    %c0_i32_1 = arith.constant 0 : i32
    return %c0_i32, %c0_i32_0 : i32, i32
  }
  func.func @transform_3(%arg0: i32) -> (i32, i32, i32) {
    %c0_i32 = arith.constant 0 : i32
    %c0_i32_0 = arith.constant 0 : i32
    %c0_i32_1 = arith.constant 0 : i32
    return %arg0, %c0_i32, %c0_i32_0 : i32, i32, i32
  }
  func.func @transform_4(%arg0: i32) -> (i32, i32, i32) {
    %c0_i32 = arith.constant 0 : i32
    %c0_i32_0 = arith.constant 0 : i32
    %c0_i32_1 = arith.constant 0 : i32
    return %arg0, %c0_i32, %c0_i32_0 : i32, i32, i32
  }
  func.func @transform_5(%arg0: i32) -> (i32, i32, i32) {
    %c0_i32 = arith.constant 0 : i32
    %c0_i32_0 = arith.constant 0 : i32
    %c0_i32_1 = arith.constant 0 : i32
    return %arg0, %c0_i32, %c0_i32_0 : i32, i32, i32
  }
  func.func @transform_6(%arg0: i32) -> (i32, i32, i32) {
    %c0_i32 = arith.constant 0 : i32
    %c0_i32_0 = arith.constant 0 : i32
    %c0_i32_1 = arith.constant 0 : i32
    return %arg0, %c0_i32, %c0_i32_0 : i32, i32, i32
  }
  func.func @transform_7(%arg0: i32) -> (i32, i32, i32) {
    %c0_i32 = arith.constant 0 : i32
    %c0_i32_0 = arith.constant 0 : i32
    %c0_i32_1 = arith.constant 0 : i32
    return %arg0, %c0_i32, %c0_i32_0 : i32, i32, i32
  }
  func.func @transform_8(%arg0: i32) -> (i32, i32, i32) {
    %c0_i32 = arith.constant 0 : i32
    %c0_i32_0 = arith.constant 0 : i32
    %c0_i32_1 = arith.constant 0 : i32
    return %arg0, %c0_i32, %c0_i32_0 : i32, i32, i32
  }
  func.func @transform_9(%arg0: i32) -> (i32, i32) {
    %c0_i32 = arith.constant 0 : i32
    %c0_i32_0 = arith.constant 0 : i32
    %c0_i32_1 = arith.constant 0 : i32
    return %c0_i32, %c0_i32_0 : i32, i32
  }
  func.func @transform_10(%arg0: i32) -> (i32, i32) {
    %c0_i32 = arith.constant 0 : i32
    %c0_i32_0 = arith.constant 0 : i32
    %c0_i32_1 = arith.constant 0 : i32
    return %c0_i32, %c0_i32_0 : i32, i32
  }
}

</mosaic_0001>

<bundles_post_ra>
// kernel: relation_gcn_forward.1
= control target key start
LH: loop header
LB: loop body
LE: loop exit
PB: predicated region body
PF: predicated region fallthrough
CT: control target
= control target key end

     0   :  { %s1372_s13 = smov 0   ;;  %s1694_s0 = inlined_call_operand.vmem [shape: bf16[64,256], index: 0, kind: input, shape index: {}]   ;;  %s1695_s1 = inlined_call_operand.vmem [shape: f32[64,128], index: 1, kind: input, shape index: {}]   ;;  %s1696_s2 = inlined_call_operand.vmem [shape: f32[1,128], index: 2, kind: input, shape index: {}]   ;;  %s1697_s3 = inlined_call_operand.vmem [shape: bf16[3,128,128], index: 3, kind: input, shape index: {}]   ;;  %s1698_s4 = inlined_call_operand.vmem [shape: f32[3,1,128], index: 4, kind: input, shape index: {}, may-alias: {4,6}]   ;;  %s1699_s5 = inlined_call_operand.vmem [shape: f32[3,1,128], index: 5, kind: input, shape index: {}]   ;;  %s1700_s6 = inlined_call_operand.vmem [shape: f32[3,1,128], index: 6, kind: input, shape index: {}, may-alias: {4,6}]   ;;  %s1701_s7 = inlined_call_operand.vmem [shape: bf16[3,128,128], index: 7, kind: input, shape index: {}]   ;;  %s1702_s8 = inlined_call_operand.vmem [shape: f32[3,1,128], index: 8, kind: input, shape index: {}]   ;;  %s1703_s9 = inlined_call_operand.vmem [shape: f32[64,128], index: 9, kind: output, shape index: {0}]   ;;  %s1704_s10 = inlined_call_operand.vmem [shape: f32[8,128], index: 10, kind: output, shape index: {1}]  }
   0x1 LB: > { %s1378_s14 = sadd.s32 4294967295, %s1312_s13   ;;  %p1119_p0 = scmp.ge.s32.totalorder %s1312_s13, 1  ;;  %s1312_s13 = sphi %s1372_s13, %s21_s13  }
   0x2   : > { %p347_p1 = scmp.lt.s32.totalorder %s1312_s13, 4 }
   0x4   : > { %p348_p2 = pnand %p1119_p0, %p347_p1 }
   0x5   : > { %p397_p3 = scmp.lt.s32.totalorder (!%p348_p2), %s1378_s14, 2  ;;  %p1124_p4 = scmp.ne.s32.totalorder (!%p348_p2), %s1378_s14, 0 }
   0x6   : > { %351 = sbr.rel (%p348_p2) target bundleno = 881 (0x371), region = 56 }
   0xd   : > { %s1384_s15 = scalar_select %p397_p3, %s1378_s14, 2 }
   0xe   : > { %423 = sbr.rel (%p1124_p4) target bundleno = 28 (0x1c), region = 60  ;;  %v424_v0 = vld [vmem:[%s1695_s1] sm:$0xff] (!%p1124_p4)  ;;  %v425_v1 = vld [vmem:[%s1695_s1 + $0x8] sm:$0xff] (!%p1124_p4)  ;;  %v426_v2 = vld [vmem:[%s1695_s1 + $0x10] sm:$0xff] (!%p1124_p4)  ;;  %v1314_v6 = vmov (!%p1124_p4), 0  }
   0xf   : > { %s1158_s16 = sshll.u32 %s1384_s15, 6  ;;  %s404_s19 = scalar_lea.vmem %s1698_s4, %s1384_s15  ;;  %432 = vst [vmem:[%s1703_s9] sm:$0xff] (!%p1124_p4), %v424_v0  ;;  %433 = vst [vmem:[%s1703_s9 + $0x8] sm:$0xff] (!%p1124_p4), %v425_v1  ;;  %v427_v3 = vld [vmem:[%s1695_s1 + $0x18] sm:$0xff] (!%p1124_p4)  ;;  %v428_v4 = vld [vmem:[%s1695_s1 + $0x20] sm:$0xff] (!%p1124_p4) }
  0x10   : > { %s1394_s22 = scalar_lea.vmem %s1697_s3, %s1158_s16  ;;  %s407_s25 = scalar_lea.vmem %s1699_s5, %s1384_s15  ;;  %434 = vst [vmem:[%s1703_s9 + $0x10] sm:$0xff] (!%p1124_p4), %v426_v2  ;;  %v429_v5 = vld [vmem:[%s1695_s1 + $0x28] sm:$0xff] (!%p1124_p4)  ;;  %448 = vst [vmem:[#allocation2] sm:$0xff] (!%p1124_p4), %v1314_v6  ;;  %v430_v7 = vld [vmem:[%s1695_s1 + $0x30] sm:$0xff] (!%p1124_p4) }
  0x11   : > { %s410_s28 = scalar_lea.vmem %s1700_s6, %s1384_s15  ;;  %s1407_s11 = scalar_lea.vmem %s1701_s7, %s1158_s16  ;;  %449 = vst [vmem:[#allocation2 + $0x8] sm:$0xff] (!%p1124_p4), %v1314_v6  ;;  %450 = vst [vmem:[#allocation2 + $0x10] sm:$0xff] (!%p1124_p4), %v1314_v6  ;;  %v431_v8 = vld [vmem:[%s1695_s1 + $0x38] sm:$0xff] (!%p1124_p4)  ;;  %v1125_v9 = vld [vmem:[%s1696_s2] ss:$0 sm:$0xff] (!%p1124_p4) }
  0x12   : > { %451 = vst [vmem:[#allocation2 + $0x18] sm:$0xff] (!%p1124_p4), %v1314_v6  ;;  %452 = vst [vmem:[#allocation2 + $0x20] sm:$0xff] (!%p1124_p4), %v1314_v6 }
  0x13   : > { %453 = vst [vmem:[#allocation2 + $0x28] sm:$0xff] (!%p1124_p4), %v1314_v6  ;;  %454 = vst [vmem:[#allocation2 + $0x30] sm:$0xff] (!%p1124_p4), %v1314_v6 }
  0x14   : > { %455 = vst [vmem:[#allocation2 + $0x38] sm:$0xff] (!%p1124_p4), %v1314_v6  ;;  %456 = vst [vmem:[#allocation2 + $0x40] sm:$0xff] (!%p1124_p4), %v1314_v6 }
  0x15   : > { %457 = vst [vmem:[#allocation2 + $0x48] sm:$0xff] %v1314_v6  ;;  %458 = vst [vmem:[#allocation2 + $0x50] sm:$0xff] %v1314_v6 }
  0x16   : > { %459 = vst [vmem:[#allocation2 + $0x58] sm:$0xff] %v1314_v6  ;;  %460 = vst [vmem:[#allocation2 + $0x60] sm:$0xff] %v1314_v6 }
  0x17   : > { %461 = vst [vmem:[#allocation2 + $0x68] sm:$0xff] %v1314_v6  ;;  %462 = vst [vmem:[#allocation2 + $0x70] sm:$0xff] %v1314_v6 }
  0x18   : > { %463 = vst [vmem:[#allocation2 + $0x78] sm:$0xff] %v1314_v6  ;;  %435 = vst [vmem:[%s1703_s9 + $0x18] sm:$0xff] %v427_v3 }
  0x19   : > { %436 = vst [vmem:[%s1703_s9 + $0x20] sm:$0xff] %v428_v4  ;;  %437 = vst [vmem:[%s1703_s9 + $0x28] sm:$0xff] %v429_v5 }
  0x1a   : > { %438 = vst [vmem:[%s1703_s9 + $0x30] sm:$0xff] %v430_v7  ;;  %439 = vst [vmem:[%s1703_s9 + $0x38] sm:$0xff] %v431_v8 }
  0x1b   : > { %447 = vst [vmem:[%s1704_s10] sm:$0xff] %v1125_v9 }
  0x1c PF: > { %vm499_vm0 = vcmask 785920   ;;  %vm489_vm1 = vcmask 261120   ;;  %vm504_vm2 = vcmask 1048320   ;;  %vm494_vm3 = vcmask 523520   ;;  %v1278_v29 = vld [vmem:[%s1694_s0 + $0x4] ss:$8 sps:$4 sm:$0xff]  }
  0x1d   : > { %v464_v10 = vld [vmem:[%s1703_s9] sm:$0xff]  ;;  %v465_v11 = vld [vmem:[%s1703_s9 + $0x8] sm:$0xff]  ;;  %605 = vmatprep.mubr.bf16.mxu0 %v1278_v29  ;;  %v1290_v37 = vld [vmem:[%s1394_s22 + $0x10] sm:$0xff]   ;;  %p1144_p5 = scmp.ge.s32.totalorder %s1378_s14, 2 }
  0x1e   : > { %v466_v15 = vld [vmem:[%s1703_s9 + $0x10] sm:$0xff]  ;;  %v1288_v32 = vld [vmem:[%s1394_s22] sm:$0xff]   ;;  %v1289_v33 = vld [vmem:[%s1394_s22 + $0x8] sm:$0xff]  }
  0x1f   : > { %v467_v16 = vld [vmem:[%s1703_s9 + $0x18] sm:$0xff]  ;;  %1221 = vmatprep.subr.bf16.mxu1 %v1288_v32  ;;  %v1276_v52 = vld [vmem:[%s1694_s0] ss:$8 sps:$4 sm:$0xff]   ;;  %v1282_v55 = vld [vmem:[%s1694_s0 + $0x24] ss:$8 sps:$4 sm:$0xff]  }
  0x20   : > { %v468_v17 = vld [vmem:[%s1703_s9 + $0x20] sm:$0xff]  ;;  %v469_v20 = vld [vmem:[%s1703_s9 + $0x28] sm:$0xff]  ;;  %1222 = vmatpush3.bf16.msra.mxu1 %v1288_v32  ;;  %v1291_v41 = vld [vmem:[%s1394_s22 + $0x18] sm:$0xff]  }
  0x21   : > { %v470_v22 = vld [vmem:[%s1703_s9 + $0x30] sm:$0xff]  ;;  %v471_v23 = vld [vmem:[%s1703_s9 + $0x38] sm:$0xff]  ;;  %1223 = vmatprep.subr.bf16.mxu1 %v1289_v33  ;;  %v1284_v56 = vld [vmem:[%s1694_s0 + $0x20] ss:$8 sps:$4 sm:$0xff]  }
  0x22   : > { %v1126_v12 = vld [vmem:[%s1704_s10] ss:$0 sm:$0xff]  ;;  %v1279_v53 = vld [vmem:[%s1694_s0 + $0x14] ss:$8 sps:$4 sm:$0xff]   ;;  %v1281_v54 = vld [vmem:[%s1694_s0 + $0x10] ss:$8 sps:$4 sm:$0xff]  }
  0x23   : > { %v477_v13 = vmul.f32 %v1126_v12, %v464_v10  ;;  %v478_v14 = vmul.f32 %v1126_v12, %v465_v11  ;;  %v479_v18 = vmul.f32 %v1126_v12, %v466_v15  ;;  %v480_v19 = vmul.f32 %v1126_v12, %v467_v16  ;;  %v1285_v57 = vld [vmem:[%s1694_s0 + $0x34] ss:$8 sps:$4 sm:$0xff]   ;;  %v1287_v58 = vld [vmem:[%s1694_s0 + $0x30] ss:$8 sps:$4 sm:$0xff]   ;;  %v1292_v59 = vld [vmem:[%s1394_s22 + $0x20] sm:$0xff]  }
  0x24   : > { %v481_v21 = vmul.f32 %v1126_v12, %v468_v17  ;;  %v482_v25 = vmul.f32 %v1126_v12, %v469_v20  ;;  %v483_v26 = vmul.f32 %v1126_v12, %v470_v22  ;;  %v484_v27 = vmul.f32 %v1126_v12, %v471_v23  ;;  %1224 = vmatpush3.bf16.msra.mxu1 %v1289_v33  ;;  %v1293_v60 = vld [vmem:[%s1394_s22 + $0x28] sm:$0xff]   ;;  %v1294_v61 = vld [vmem:[%s1394_s22 + $0x30] sm:$0xff]   ;;  %v1295_v62 = vld [vmem:[%s1394_s22 + $0x38] sm:$0xff]  }
  0x25   : > { %v485_v24 = vpack.c.bf16 %v478_v14, %v477_v13  ;;  %v486_v28 = vpack.c.bf16 %v480_v19, %v479_v18  ;;  %1225 = vmatprep.subr.bf16.mxu1 %v1290_v37 }
  0x26   : > { %v487_v30 = vpack.c.bf16 %v482_v25, %v481_v21  ;;  %v488_v31 = vpack.c.bf16 %v484_v27, %v483_v26  ;;  %v1135_v27 = vld [vmem:[%s404_s19] ss:$0 sm:$0xff] }
  0x27   : > { %500 = vst.msk [vmem:[#allocation2 + $0x40] sm:$0xff] %vm499_vm0, %v485_v24  ;;  %501 = vst.msk [vmem:[#allocation2 + $0x48] sm:$0xff] %vm499_vm0, %v486_v28 }
  0x28   : > { %490 = vst.msk [vmem:[#allocation2] sm:$0xff] %vm489_vm1, %v485_v24  ;;  %491 = vst.msk [vmem:[#allocation2 + $0x8] sm:$0xff] %vm489_vm1, %v486_v28  ;;  %1226 = vmatpush3.bf16.msra.mxu1 %v1290_v37 }
  0x29   : > { %505 = vst.msk [vmem:[#allocation2 + $0x60] sm:$0xff] %vm504_vm2, %v485_v24  ;;  %506 = vst.msk [vmem:[#allocation2 + $0x68] sm:$0xff] %vm504_vm2, %v486_v28  ;;  %1227 = vmatprep.subr.bf16.mxu1 %v1291_v41 }
  0x2a   : > { %495 = vst.msk [vmem:[#allocation2 + $0x20] sm:$0xff] %vm494_vm3, %v485_v24  ;;  %496 = vst.msk [vmem:[#allocation2 + $0x28] sm:$0xff] %vm494_vm3, %v486_v28 }
  0x2b   : > { %502 = vst.msk [vmem:[#allocation2 + $0x50] sm:$0xff] %vm499_vm0, %v487_v30  ;;  %503 = vst.msk [vmem:[#allocation2 + $0x58] sm:$0xff] %vm499_vm0, %v488_v31 }
  0x2c   : > { %492 = vst.msk [vmem:[#allocation2 + $0x10] sm:$0xff] %vm489_vm1, %v487_v30  ;;  %493 = vst.msk [vmem:[#allocation2 + $0x18] sm:$0xff] %vm489_vm1, %v488_v31  ;;  %1228 = vmatpush3.bf16.msra.mxu1 %v1291_v41 }
  0x2d   : > { %507 = vst.msk [vmem:[#allocation2 + $0x70] sm:$0xff] %vm504_vm2, %v487_v30  ;;  %508 = vst.msk [vmem:[#allocation2 + $0x78] sm:$0xff] %vm504_vm2, %v488_v31  ;;  %1229 = vmatprep.subr.bf16.mxu1 %v1292_v59 }
  0x2e   : > { %497 = vst.msk [vmem:[#allocation2 + $0x30] sm:$0xff] %vm494_vm3, %v487_v30  ;;  %498 = vst.msk [vmem:[#allocation2 + $0x38] sm:$0xff] %vm494_vm3, %v488_v31  ;;  %v525_v34 = vld [vmem:[#allocation2 + $0x40] sm:$0xff]  ;;  %v526_v36 = vld [vmem:[#allocation2 + $0x48] sm:$0xff] }
  0x2f   : > { %v517_v35 = vld [vmem:[#allocation2] sm:$0xff]  ;;  %1160 = vmatprep.subr.bf16.mxu0 %v525_v34  ;;  %v518_v38 = vld [vmem:[#allocation2 + $0x8] sm:$0xff] }
  0x30   : > { %1161 = vmatpush3.bf16.msra.mxu0 %v517_v35  ;;  %v529_v44 = vld [vmem:[#allocation2 + $0x60] sm:$0xff]  ;;  %v530_v46 = vld [vmem:[#allocation2 + $0x68] sm:$0xff]  ;;  %1230 = vmatpush3.bf16.msra.mxu1 %v1292_v59 }
  0x31   : > { %1162 = vmatprep.subr.bf16.mxu0 %v526_v36  ;;  %v521_v45 = vld [vmem:[#allocation2 + $0x20] sm:$0xff]  ;;  %v522_v47 = vld [vmem:[#allocation2 + $0x28] sm:$0xff]  ;;  %1231 = vmatprep.subr.bf16.mxu1 %v1293_v60 }
  0x32   : > { %v527_v39 = vld [vmem:[#allocation2 + $0x50] sm:$0xff]  ;;  %v528_v42 = vld [vmem:[#allocation2 + $0x58] sm:$0xff] }
  0x33   : > { %v519_v40 = vld [vmem:[#allocation2 + $0x10] sm:$0xff]  ;;  %v520_v43 = vld [vmem:[#allocation2 + $0x18] sm:$0xff] }
  0x34   : > { %1163 = vmatpush3.bf16.msra.mxu0 %v518_v38  ;;  %v531_v48 = vld [vmem:[#allocation2 + $0x70] sm:$0xff]  ;;  %v532_v50 = vld [vmem:[#allocation2 + $0x78] sm:$0xff]  ;;  %1232 = vmatpush3.bf16.msra.mxu1 %v1293_v60 }
  0x35   : > { %1164 = vmatprep.subr.bf16.mxu0 %v527_v39  ;;  %v523_v49 = vld [vmem:[#allocation2 + $0x30] sm:$0xff]  ;;  %v524_v51 = vld [vmem:[#allocation2 + $0x38] sm:$0xff]  ;;  %1233 = vmatprep.subr.bf16.mxu1 %v1294_v61 }
  0x38   : > { %1165 = vmatpush3.bf16.msra.mxu0 %v519_v40  ;;  %1234 = vmatpush3.bf16.msra.mxu1 %v1294_v61 }
  0x39   : > { %1166 = vmatprep.subr.bf16.mxu0 %v528_v42  ;;  %1235 = vmatprep.subr.bf16.mxu1 %v1295_v62 }
  0x3c   : > { %1167 = vmatpush3.bf16.msra.mxu0 %v520_v43  ;;  %1236 = vmatpush3.bf16.msra.mxu1 %v1295_v62 }
  0x3d   : > { %1168 = vmatprep.subr.bf16.mxu0 %v529_v44 }
  0x40   : > { %1169 = vmatpush3.bf16.msra.mxu0 %v521_v45 }
  0x41   : > { %1170 = vmatprep.subr.bf16.mxu0 %v530_v46 }
  0x44   : > { %1171 = vmatpush3.bf16.msra.mxu0 %v522_v47 }
  0x45   : > { %1172 = vmatprep.subr.bf16.mxu0 %v531_v48 }
  0x48   : > { %1173 = vmatpush3.bf16.msra.mxu0 %v523_v49 }
  0x49   : > { %1174 = vmatprep.subr.bf16.mxu0 %v532_v50 }
  0x4c   : > { %1175 = vmatpush3.bf16.msra.mxu0 %v524_v51 }
  0x4f   : > { %606 = vmatmul.mubr.bf16.vlgmr.msra.gmra.mrb[0].mxu0 %v1276_v52 }
  0x50   : > { %613 = vmatprep.mubr.bf16.mxu0 %v1279_v53 }
  0x57   : > { %614 = vmatmul.mubr.bf16.gmra.mrb[4].mxu0 %v1281_v54 }
  0x58   : > { %621 = vmatprep.mubr.bf16.mxu0 %v1282_v55 }
  0x5f   : > { %622 = vmatmul.mubr.bf16.gmra.mrb[8].mxu0 %v1284_v56 }
  0x60   : > { %629 = vmatprep.mubr.bf16.mxu0 %v1285_v57 }
  0x67   : > { %630 = vmatmul.mubr.bf16.gmra.mrb[12].mxu0 %v1287_v58 }
 0x122   : > { %v1176_v63 = vpop.f32.mrb[0].mxu0 }
 0x123   : > { %v1177_v0 = vpop.f32.mrb[1].mxu0 }
 0x124   : > { %v1178_v1 = vadd.f32 %v1177_v0, %v1176_v63  ;;  %v1179_v2 = vpop.f32.mrb[2].mxu0 }
 0x125   : > { %v1180_v3 = vpop.f32.mrb[3].mxu0 }
 0x126   : > { %v1181_v4 = vadd.f32 %v1180_v3, %v1179_v2 }
 0x128   : > { %v638_v5 = vpack.c.bf16 %v1181_v4, %v1178_v1 }
 0x12a   : > { %v1182_v6 = vpop.f32.mrb[4].mxu0  ;;  %1237 = vmatprep.mubr.bf16.mxu1 %v638_v5 }
 0x12b   : > { %v1183_v7 = vpop.f32.mrb[5].mxu0 }
 0x12c   : > { %v1184_v8 = vadd.f32 %v1183_v7, %v1182_v6  ;;  %v1185_v9 = vpop.f32.mrb[6].mxu0 }
 0x12d   : > { %v1186_v10 = vpop.f32.mrb[7].mxu0 }
 0x12e   : > { %v1187_v11 = vadd.f32 %v1186_v10, %v1185_v9 }
 0x130   : > { %v639_v12 = vpack.c.bf16 %v1187_v11, %v1184_v8 }
 0x132   : > { %v1188_v13 = vpop.f32.mrb[8].mxu0  ;;  %1238 = vmatmul.mubr.bf16.vlgmr.msra.gmra.mrb[0].mxu1 %v639_v12 }
 0x133   : > { %v1189_v14 = vpop.f32.mrb[9].mxu0 }
 0x134   : > { %v1190_v15 = vadd.f32 %v1189_v14, %v1188_v13  ;;  %v1191_v16 = vpop.f32.mrb[10].mxu0 }
 0x135   : > { %v1192_v17 = vpop.f32.mrb[11].mxu0 }
 0x136   : > { %v1193_v18 = vadd.f32 %v1192_v17, %v1191_v16 }
 0x138   : > { %v640_v19 = vpack.c.bf16 %v1193_v18, %v1190_v15 }
 0x13a   : > { %v1194_v20 = vpop.f32.mrb[12].mxu0  ;;  %1241 = vmatprep.mubr.bf16.mxu1 %v640_v19 }
 0x13b   : > { %v1195_v21 = vpop.f32.mrb[13].mxu0 }
 0x13c   : > { %v1196_v22 = vadd.f32 %v1195_v21, %v1194_v20  ;;  %v1197_v23 = vpop.f32.mrb[14].mxu0 }
 0x13d   : > { %v1198_v24 = vpop.f32.mrb[15].mxu0 }
 0x13e   : > { %v1199_v25 = vadd.f32 %v1198_v24, %v1197_v23 }
 0x140   : > { %v641_v26 = vpack.c.bf16 %v1199_v25, %v1196_v22  ;;  %v832_v25 = vlaneseq (!%p1144_p5) }
 0x142   : > { %1242 = vmatmul.mubr.bf16.gmra.mrb[4].mxu1 %v641_v26  ;;  %v833_v26 = vshrl.u32 (!%p1144_p5), %v832_v25, 7 }
 0x205   : > { %v1239_v28 = vpop.f32.mrb[0].mxu1 }
 0x206   : > { %v1548_v29 = vadd.f32 %v1239_v28, %v1135_v27  ;;  %v747_v30 = vpop.f32.mrb[1].mxu1  ;;  %v834_v28 = vsub.s32 (!%p1144_p5), 0, %v833_v26 }
 0x207   : > { %v1550_v31 = vadd.f32 %v1135_v27, %v747_v30  ;;  %v1240_v32 = vpop.f32.mrb[2].mxu1 }
 0x208   : > { %v1552_v33 = vadd.f32 %v1240_v32, %v1135_v27  ;;  %v750_v34 = vpop.f32.mrb[3].mxu1 }
 0x209   : > { %v1554_v35 = vadd.f32 %v1135_v27, %v750_v34 }
 0x20b   : > { %v782_v44 = vadd.f32 (!%p1144_p5), %v1554_v35, %v1550_v31 }
 0x20d   : > { %v783_v45 = vadd.f32 (!%p1144_p5), %v782_v44, %v1548_v29 }
 0x20f   : > { %v784_v46 = vadd.f32 (!%p1144_p5), %v783_v45, %v1552_v33 }
 0x213   : > { %781 = sbr.rel (%p1144_p5) target bundleno = 624 (0x270), region = 64 }
 0x215   : > { %v1243_v36 = vpop.f32.mrb[4].mxu1 }
 0x216   : > { %v1556_v37 = vadd.f32 %v1243_v36, %v1135_v27  ;;  %v763_v38 = vpop.f32.mrb[5].mxu1  ;;  %v1145_v36 = vld [vmem:[%s410_s28] ss:$0 sm:$0xff] (!%p1144_p5) }
 0x217   : > { %v1558_v39 = vadd.f32 %v1135_v27, %v763_v38  ;;  %v1244_v40 = vpop.f32.mrb[6].mxu1 }
 0x218   : > { %v1560_v41 = vadd.f32 %v1244_v40, %v1135_v27  ;;  %v766_v42 = vpop.f32.mrb[7].mxu1 }
 0x219   : > { %v1562_v43 = vadd.f32 %v1135_v27, %v766_v42  ;;  %v785_v47 = vadd.f32 (!%p1144_p5), %v784_v46, %v1558_v39  ;;  %v827_v27 = vld [vmem:[%s407_s25] sm:$0x1] (!%p1144_p5) }
 0x21b   : > { %v786_v48 = vadd.f32 %v785_v47, %v1562_v43 }
 0x21d   : > { %v787_v49 = vadd.f32 %v786_v48, %v1556_v37 }
 0x21f   : > { %v788_v50 = vadd.f32 %v787_v49, %v1560_v41 }
 0x221   : > { %v789_v51 = vrot.slane %v788_v50, 4 }
 0x223   : > { %v790_v52 = vadd.f32 %v789_v51, %v788_v50  ;;  %v884_v50 = vld [vmem:[%s1703_s9] sm:$0xff] }
 0x225   : > { %v791_v53 = vrot.slane %v790_v52, 2 }
 0x227   : > { %v792_v54 = vadd.f32 %v791_v53, %v790_v52 }
 0x229   : > { %v793_v55 = vrot.slane %v792_v54, 1 }
 0x22b   : > { %v794_v56 = vadd.f32 %v793_v55, %v792_v54  ;;  %v885_v54 = vld [vmem:[%s1703_s9 + $0x8] sm:$0xff]  ;;  %v886_v55 = vld [vmem:[%s1703_s9 + $0x10] sm:$0xff] }
 0x22d   : > { %v796_v57 = vmul.f32 0.015625, %v794_v56  ;;  %v887_v56 = vld [vmem:[%s1703_s9 + $0x18] sm:$0xff] }
 0x22f   : > { %v797_v58 = vsub.f32 %v1550_v31, %v796_v57  ;;  %v798_v59 = vsub.f32 %v1554_v35, %v796_v57  ;;  %v799_v60 = vsub.f32 %v1548_v29, %v796_v57  ;;  %v800_v61 = vsub.f32 %v1552_v33, %v796_v57 }
 0x230   : > { %v801_v62 = vsub.f32 %v1558_v39, %v796_v57  ;;  %v802_v2 = vsub.f32 %v1562_v43, %v796_v57  ;;  %v803_v5 = vsub.f32 %v1556_v37, %v796_v57  ;;  %v804_v8 = vsub.f32 %v1560_v41, %v796_v57 }
 0x231   : > { %v805_v63 = vmul.f32 %v797_v58, %v797_v58  ;;  %v806_v0 = vmul.f32 %v798_v59, %v798_v59  ;;  %v807_v1 = vmul.f32 %v799_v60, %v799_v60  ;;  %v808_v3 = vmul.f32 %v800_v61, %v800_v61 }
 0x232   : > { %v809_v6 = vmul.f32 %v801_v62, %v801_v62  ;;  %v810_v9 = vmul.f32 %v802_v2, %v802_v2  ;;  %v811_v11 = vmul.f32 %v803_v5, %v803_v5  ;;  %v812_v13 = vmul.f32 %v804_v8, %v804_v8 }
 0x233   : > { %v813_v4 = vadd.f32 %v806_v0, %v805_v63 }
 0x235   : > { %v814_v7 = vadd.f32 %v813_v4, %v807_v1  ;;  %v888_v4 = vld [vmem:[%s1703_s9 + $0x20] sm:$0xff] }
 0x237   : > { %v815_v10 = vadd.f32 %v814_v7, %v808_v3 }
 0x239   : > { %v816_v12 = vadd.f32 %v815_v10, %v809_v6 }
 0x23b   : > { %v817_v14 = vadd.f32 %v816_v12, %v810_v9  ;;  %v889_v12 = vld [vmem:[%s1703_s9 + $0x28] sm:$0xff] }
 0x23d   : > { %v818_v15 = vadd.f32 %v817_v14, %v811_v11 }
 0x23f   : > { %v819_v16 = vadd.f32 %v818_v15, %v812_v13 }
 0x241   : > { %v820_v17 = vrot.slane %v819_v16, 4 }
 0x243   : > { %v821_v18 = vadd.f32 %v820_v17, %v819_v16  ;;  %v890_v16 = vld [vmem:[%s1703_s9 + $0x30] sm:$0xff] }
 0x245   : > { %v822_v19 = vrot.slane %v821_v18, 2 }
 0x247   : > { %v823_v20 = vadd.f32 %v822_v19, %v821_v18  ;;  %v891_v18 = vld [vmem:[%s1703_s9 + $0x38] sm:$0xff] }
 0x249   : > { %v824_v21 = vrot.slane %v823_v20, 1 }
 0x24b   : > { %v825_v22 = vadd.f32 %v824_v21, %v823_v20 }
 0x24d   : > { %v826_v23 = vmul.f32 0.015625, %v825_v22 }
 0x24f   : > { %v828_v24 = vadd.f32 1e-05, %v826_v23 }
 0x251   : > { %1296 = vrsqrt.f32 %v828_v24 }
 0x25b   : > { %v1297_v30 = vpop.eup %1296 }
 0x25c   : > { %v830_v32 = vmul.f32 %v1297_v30, %v827_v27 }
 0x25e   : > { %v835_v34 = vrot.slane %v830_v32, %v834_v28 }
 0x260   : > { %v837_v38 = vmul.f32 %v835_v34, %v797_v58  ;;  %v838_v40 = vmul.f32 %v835_v34, %v798_v59  ;;  %v839_v42 = vmul.f32 %v835_v34, %v799_v60  ;;  %v840_v44 = vmul.f32 %v835_v34, %v800_v61 }
 0x261   : > { %v841_v45 = vmul.f32 %v835_v34, %v801_v62  ;;  %v842_v46 = vmul.f32 %v835_v34, %v802_v2  ;;  %v843_v47 = vmul.f32 %v835_v34, %v803_v5  ;;  %v844_v48 = vmul.f32 %v835_v34, %v804_v8 }
 0x262   : > { %v852_v49 = vadd.f32 %v1145_v36, %v837_v38  ;;  %v853_v51 = vadd.f32 %v1145_v36, %v838_v40  ;;  %v854_v52 = vadd.f32 %v1145_v36, %v839_v42  ;;  %v855_v53 = vadd.f32 %v1145_v36, %v840_v44 }
 0x263   : > { %v856_v57 = vadd.f32 %v1145_v36, %v841_v45  ;;  %v857_v58 = vadd.f32 %v1145_v36, %v842_v46  ;;  %v858_v59 = vadd.f32 %v1145_v36, %v843_v47  ;;  %v859_v60 = vadd.f32 %v1145_v36, %v844_v48 }
 0x264   : > { %vm860_vm4 = vcmp.ge.f32.partialorder %v852_v49, 0.0  ;;  %v868_v61 = vmul.f32 0.01, %v852_v49  ;;  %vm861_vm5 = vcmp.ge.f32.partialorder %v853_v51, 0.0  ;;  %v869_v62 = vmul.f32 0.01, %v853_v51 }
 0x265   : > { %vm862_vm6 = vcmp.ge.f32.partialorder %v854_v52, 0.0  ;;  %v870_v63 = vmul.f32 0.01, %v854_v52  ;;  %vm863_vm7 = vcmp.ge.f32.partialorder %v855_v53, 0.0  ;;  %v871_v0 = vmul.f32 0.01, %v855_v53 }
 0x266   : > { %v876_v1 = vsel %vm860_vm4, %v852_v49, %v868_v61  ;;  %v877_v2 = vsel %vm861_vm5, %v853_v51, %v869_v62  ;;  %vm864_vm8 = vcmp.ge.f32.partialorder %v856_v57, 0.0  ;;  %v872_v3 = vmul.f32 0.01, %v856_v57 }
 0x267   : > { %v892_v5 = vadd.f32 %v884_v50, %v876_v1  ;;  %v893_v6 = vadd.f32 %v885_v54, %v877_v2  ;;  %v878_v7 = vsel %vm862_vm6, %v854_v52, %v870_v63  ;;  %v879_v8 = vsel %vm863_vm7, %v855_v53, %v871_v0 }
 0x268   : > { %v894_v9 = vadd.f32 %v886_v55, %v878_v7  ;;  %v895_v10 = vadd.f32 %v887_v56, %v879_v8  ;;  %v880_v11 = vsel %vm864_vm8, %v856_v57, %v872_v3  ;;  %vm865_vm9 = vcmp.ge.f32.partialorder %v857_v58, 0.0 }
 0x269   : > { %900 = vst [vmem:[%s1703_s9] sm:$0xff] %v892_v5  ;;  %901 = vst [vmem:[%s1703_s9 + $0x8] sm:$0xff] %v893_v6  ;;  %v896_v13 = vadd.f32 %v888_v4, %v880_v11  ;;  %v873_v14 = vmul.f32 0.01, %v857_v58  ;;  %vm866_vm10 = vcmp.ge.f32.partialorder %v858_v59, 0.0  ;;  %v874_v15 = vmul.f32 0.01, %v858_v59 }
 0x26a   : > { %902 = vst [vmem:[%s1703_s9 + $0x10] sm:$0xff] %v894_v9  ;;  %903 = vst [vmem:[%s1703_s9 + $0x18] sm:$0xff] %v895_v10  ;;  %vm867_vm11 = vcmp.ge.f32.partialorder %v859_v60, 0.0  ;;  %v875_v17 = vmul.f32 0.01, %v859_v60 }
 0x26b   : > { %904 = vst [vmem:[%s1703_s9 + $0x20] sm:$0xff] %v896_v13  ;;  %v881_v19 = vsel %vm865_vm9, %v857_v58, %v873_v14  ;;  %v882_v20 = vsel %vm866_vm10, %v858_v59, %v874_v15 }
 0x26c   : > { %v897_v21 = vadd.f32 %v889_v12, %v881_v19  ;;  %v898_v22 = vadd.f32 %v890_v16, %v882_v20  ;;  %v883_v23 = vsel %vm867_vm11, %v859_v60, %v875_v17 }
 0x26d   : > { %v899_v24 = vadd.f32 %v891_v18, %v883_v23 }
 0x26e   : > { %905 = vst [vmem:[%s1703_s9 + $0x28] sm:$0xff] %v897_v21  ;;  %906 = vst [vmem:[%s1703_s9 + $0x30] sm:$0xff] %v898_v22 }
 0x26f   : > { %907 = vst [vmem:[%s1703_s9 + $0x38] sm:$0xff] %v899_v24 }
 0x270 PF: > { %p1146_p6 = scmp.ne.s32.totalorder %s1378_s14, 2 }
 0x271   : > { %912 = vst [vmem:[%s1703_s9] sm:$0xff] (!%p1146_p6), %v1550_v31  ;;  %913 = vst [vmem:[%s1703_s9 + $0x8] sm:$0xff] (!%p1146_p6), %v1554_v35 }
 0x272   : > { %911 = sbr.rel (%p1146_p6) target bundleno = 633 (0x279), region = 68  ;;  %914 = vst [vmem:[%s1703_s9 + $0x10] sm:$0xff] (!%p1146_p6), %v1548_v29  ;;  %915 = vst [vmem:[%s1703_s9 + $0x18] sm:$0xff] (!%p1146_p6), %v1552_v33 }
 0x273   : > { %916 = vst [vmem:[%s1703_s9 + $0x20] sm:$0xff] (!%p1146_p6), %v1558_v39  ;;  %917 = vst [vmem:[%s1703_s9 + $0x28] sm:$0xff] (!%p1146_p6), %v1562_v43 }
 0x274   : > { %918 = vst [vmem:[%s1703_s9 + $0x30] sm:$0xff] (!%p1146_p6), %v1556_v37  ;;  %919 = vst [vmem:[%s1703_s9 + $0x38] sm:$0xff] (!%p1146_p6), %v1560_v41 }
 0x279 PF: > { %v1298_v29 = vld [vmem:[%s1407_s11] sm:$0xff]   ;;  %v1315_v31 = vmov 0.0   ;;  %v1299_v33 = vld [vmem:[%s1407_s11 + $0x8] sm:$0xff]   ;;  %vm1316_vm12 = vmmov 0   ;;  %v1300_v35 = vld [vmem:[%s1407_s11 + $0x10] sm:$0xff]   ;;  %s1705_s26 = scalar_lea.vmem %s1702_s8, %s1384_s15 }
 0x27a   : > { %1245 = vmatprep.subr.bf16.mxu0 %v1315_v31  ;;  %1261 = vmatprep.mubr.msk.bf16.mxu0 %vm1316_vm12, %v1315_v31  ;;  %v1301_v37 = vld [vmem:[%s1407_s11 + $0x18] sm:$0xff]   ;;  %v1302_v39 = vld [vmem:[%s1407_s11 + $0x20] sm:$0xff]   ;;  %v1303_v41 = vld [vmem:[%s1407_s11 + $0x28] sm:$0xff]  }
 0x27b   : > { %1246 = vmatpush3.bf16.msra.mxu0 %v1298_v29  ;;  %v1304_v43 = vld [vmem:[%s1407_s11 + $0x30] sm:$0xff]   ;;  %v1305_v25 = vld [vmem:[%s1407_s11 + $0x38] sm:$0xff]   ;;  %v920_v26 = vld [vmem:[%s1704_s10] sm:$0xff] }
 0x27c   : > { %1247 = vmatprep.subr.bf16.mxu0 %v1315_v31  ;;  %v921_v27 = vpack.c.bf16 %v920_v26, %v920_v26  ;;  %v1147_v28 = vld [vmem:[%s1705_s26] ss:$0 sm:$0xff] }
 0x27f   : > { %1248 = vmatpush3.bf16.msra.mxu0 %v1299_v33 }
 0x280   : > { %1249 = vmatprep.subr.bf16.mxu0 %v1315_v31 }
 0x283   : > { %1250 = vmatpush3.bf16.msra.mxu0 %v1300_v35 }
 0x284   : > { %1251 = vmatprep.subr.bf16.mxu0 %v1315_v31 }
 0x287   : > { %1252 = vmatpush3.bf16.msra.mxu0 %v1301_v37 }
 0x288   : > { %1253 = vmatprep.subr.bf16.mxu0 %v1315_v31 }
 0x28b   : > { %1254 = vmatpush3.bf16.msra.mxu0 %v1302_v39 }
 0x28c   : > { %1255 = vmatprep.subr.bf16.mxu0 %v1315_v31 }
 0x28f   : > { %1256 = vmatpush3.bf16.msra.mxu0 %v1303_v41 }
 0x290   : > { %1257 = vmatprep.subr.bf16.mxu0 %v1315_v31 }
 0x293   : > { %1258 = vmatpush3.bf16.msra.mxu0 %v1304_v43 }
 0x294   : > { %1259 = vmatprep.subr.bf16.mxu0 %v1315_v31 }
 0x297   : > { %1260 = vmatpush3.bf16.msra.mxu0 %v1305_v25 }
 0x29a   : > { %1262 = vmatmul.mubr.bf16.vlgmr.msra.gmra.mrb[16].mxu0 %v921_v27 }
 0x36d   : > { %v1027_v30 = vpop.f32.mrb[16].mxu0 }
 0x36e   : > { %v1028_v32 = vadd.f32 %v1147_v28, %v1027_v30  ;;  %v1263_v34 = vpop.f32.mrb[17].mxu0 }
 0x36f   : > { %v1030_v36 = vpop.f32.mrb[18].mxu0 }
 0x370   : > { %1033 = vst [vmem:[%s1704_s10] sm:$0xff] %v1028_v32  ;;  %v1264_v38 = vpop.f32.mrb[19].mxu0 }
 0x371 PF: > { %s21_s13 = sadd.s32 1, %s1312_s13  }
 0x372   : > { %p18_p7 = scmp.ge.s32.totalorder %s21_s13, 5  }
 0x374   :  { %20 = sbr.rel (!%p18_p7) target bundleno = 1 (0x1), region = 117 }

</bundles_post_ra>
